<compile_context>
chip_gen: v5e
topology: v5e:2x2
jax: 0.10.0
libtpu: 0.0.40
codegen_flags: <defaults>
</compile_context>

<pallas_src>
import functools

import jax
import jax.numpy as jnp
from jax.experimental import pallas as pl
from jax.experimental.pallas import tpu as pltpu


def _round_up(a: int, b: int) -> int:
    return ((a + b - 1) // b) * b


def _ffn_kernel(x_ref, w1_ref, b1_ref, w2_ref, b2_ref, o_ref):
    # x_ref: (tm, Hp) row tile.  w1/w2: full (Hp, Hp) resident in VMEM.  b1/b2: (1, Hp).
    x = x_ref[...]                                             # native dtype into MXU
    h = jnp.dot(x, w1_ref[...], preferred_element_type=jnp.float32) + b1_ref[...]
    h = jnp.maximum(h, 0.0)                                    # ReLU (if_gelu=False)
    # dropout1 / dropout2: identity in eval mode
    y = jnp.dot(h.astype(w2_ref.dtype), w2_ref[...],
                preferred_element_type=jnp.float32) + b2_ref[...]
    o_ref[...] = (y + x.astype(jnp.float32)).astype(o_ref.dtype)   # residual add


@functools.partial(jax.jit, static_argnames=("tile_m",))
def pointwise_ffn(x, w1, b1, w2, b2, *, tile_m=512):
    """x: (B, L, H).  w1, w2: (H, H) used as x @ W.  b1, b2: (H,)."""
    B, L, H = x.shape
    M = B * L

    Hp = _round_up(max(H, 128), 128)            # lane-dense hidden dim
    tm = _round_up(min(tile_m, M), 8)           # row tile: multiple of 8 sublanes
    Mp = _round_up(M, tm)

    x2 = x.reshape(M, H)
    if (Mp, Hp) != (M, H):
        x2 = jnp.pad(x2, ((0, Mp - M), (0, Hp - H)))
    if Hp != H:
        w1p = jnp.pad(w1, ((0, Hp - H), (0, Hp - H)))
        w2p = jnp.pad(w2, ((0, Hp - H), (0, Hp - H)))
        b1p = jnp.pad(b1.reshape(1, H), ((0, 0), (0, Hp - H)))
        b2p = jnp.pad(b2.reshape(1, H), ((0, 0), (0, Hp - H)))
    else:
        w1p, w2p = w1, w2
        b1p, b2p = b1.reshape(1, H), b2.reshape(1, H)

    grid = (Mp // tm,)

    def _nbytes(a):
        return a.size * a.dtype.itemsize

    cost = pl.CostEstimate(
        flops=4 * Mp * Hp * Hp,                    # two (Mp,Hp)x(Hp,Hp) matmuls
        transcendentals=0,
        bytes_accessed=2 * Mp * Hp * x2.dtype.itemsize
        + _nbytes(w1p) + _nbytes(w2p) + _nbytes(b1p) + _nbytes(b2p),
    )

    # Weights/biases: whole array placed in VMEM once, resident across all grid steps.
    resident_vmem = pl.BlockSpec(memory_space=pltpu.MemorySpace.VMEM)

    out = pl.pallas_call(
        _ffn_kernel,
        out_shape=jax.ShapeDtypeStruct((Mp, Hp), x.dtype),
        grid_spec=pltpu.PrefetchScalarGridSpec(
            num_scalar_prefetch=0,
            grid=grid,
            in_specs=[
                pl.BlockSpec((tm, Hp), lambda i: (i, 0)),   # x row tile (pipelined)
                resident_vmem,                              # W1 (full, single copy)
                resident_vmem,                              # b1
                resident_vmem,                              # W2
                resident_vmem,                              # b2
            ],
            out_specs=pl.BlockSpec((tm, Hp), lambda i: (i, 0)),
        ),
        compiler_params=pltpu.CompilerParams(
            dimension_semantics=("parallel",),
            vmem_limit_bytes=64 * 1024 * 1024,
        ),
        cost_estimate=cost,
    )(x2, w1p, b1p, w2p, b2p)

    return out[:M, :H].reshape(B, L, H)


def reference_ffn(x, w1, b1, w2, b2):
    hi = jax.lax.Precision.HIGHEST
    h = jnp.maximum(jnp.einsum("blh,hk->blk", x, w1, precision=hi) + b1, 0.0)
    y = jnp.einsum("blh,hk->blk", h, w2, precision=hi) + b2
    return y + x


def _make_params(key, H):
    kw1, kb1, kw2, kb2 = jax.random.split(key, 4)
    bound = 1.0 / (H ** 0.5)
    w1 = jax.random.uniform(kw1, (H, H), minval=-bound, maxval=bound, dtype=jnp.float32)
    b1 = jax.random.uniform(kb1, (H,), minval=-bound, maxval=bound, dtype=jnp.float32)
    w2 = jax.random.uniform(kw2, (H, H), minval=-bound, maxval=bound, dtype=jnp.float32)
    b2 = jax.random.uniform(kb2, (H,), minval=-bound, maxval=bound, dtype=jnp.float32)
    return w1, b1, w2, b2


if __name__ == "__main__":
    key = jax.random.PRNGKey(0)

    # Primary small shape consistent with the module: batch=2, seq=8, hidden=32.
    B, L, H = 2, 8, 32
    kx, kp = jax.random.split(key)
    x = jax.random.normal(kx, (B, L, H), dtype=jnp.float32)
    w1, b1, w2, b2 = _make_params(kp, H)

    out = pointwise_ffn(x, w1, b1, w2, b2)
    out = jax.block_until_ready(out)
    ref = reference_ffn(x, w1, b1, w2, b2)
    assert jnp.allclose(out, ref, atol=1e-4, rtol=1e-4), "mismatch vs reference (shape 1)"

    # Second small shape exercising row + hidden padding paths.
    B2, L2, H2 = 3, 10, 48
    kx2, kp2 = jax.random.split(kp)
    x2 = jax.random.normal(kx2, (B2, L2, H2), dtype=jnp.float32)
    p2 = _make_params(kp2, H2)
    out2 = jax.block_until_ready(pointwise_ffn(x2, *p2))
    ref2 = reference_ffn(x2, *p2)
    assert jnp.allclose(out2, ref2, atol=1e-4, rtol=1e-4), "mismatch vs reference (shape 2)"

    print("KERNEL_OK")
</pallas_src>

<mosaic_0001>
module attributes {stable_mosaic.version = 11 : i64} {
  func.func @_ffn_kernel(%arg0: i32, %arg1: memref<16x128xf32, #tpu.memory_space<vmem>>, %arg2: memref<128x128xf32, #tpu.memory_space<vmem>>, %arg3: memref<1x128xf32, #tpu.memory_space<vmem>>, %arg4: memref<128x128xf32, #tpu.memory_space<vmem>>, %arg5: memref<1x128xf32, #tpu.memory_space<vmem>>, %arg6: memref<16x128xf32, #tpu.memory_space<vmem>>) attributes {dimension_semantics = [#tpu.dimension_semantics<parallel>], iteration_bounds = array<i64: 1>, scalar_prefetch = 0 : i64, scratch_operands = 0 : i64, tpu.core_type = #tpu.core_type<tc>, window_params = [{transform_indices = @transform_0, window_bounds = array<i64: 16, 128>}, {pipeline_mode = #tpu.pipeline_mode<synchronous>, transform_indices = @transform_1, window_bounds = array<i64: 128, 128>}, {pipeline_mode = #tpu.pipeline_mode<synchronous>, transform_indices = @transform_2, window_bounds = array<i64: 1, 128>}, {pipeline_mode = #tpu.pipeline_mode<synchronous>, transform_indices = @transform_3, window_bounds = array<i64: 128, 128>}, {pipeline_mode = #tpu.pipeline_mode<synchronous>, transform_indices = @transform_4, window_bounds = array<i64: 1, 128>}, {transform_indices = @transform_5, window_bounds = array<i64: 16, 128>}]} {
    %c0 = arith.constant 0 : index
    %c0_0 = arith.constant 0 : index
    %0 = vector.load %arg1[%c0, %c0_0] : memref<16x128xf32, #tpu.memory_space<vmem>>, vector<16x128xf32>
    %c0_1 = arith.constant 0 : index
    %c0_2 = arith.constant 0 : index
    %1 = vector.load %arg2[%c0_1, %c0_2] : memref<128x128xf32, #tpu.memory_space<vmem>>, vector<128x128xf32>
    %cst = arith.constant dense<0.000000e+00> : vector<16x128xf32>
    %2 = tpu.matmul %0, %1, %cst {dimension_numbers = #tpu.dot_dimension_numbers<[1], [0], [0], [1], [0, 0, 1, 1], [], []>} : vector<16x128xf32>, vector<128x128xf32>, vector<16x128xf32> -> vector<16x128xf32>
    %c0_3 = arith.constant 0 : index
    %c0_4 = arith.constant 0 : index
    %3 = vector.load %arg3[%c0_3, %c0_4] : memref<1x128xf32, #tpu.memory_space<vmem>>, vector<1x128xf32>
    %4 = vector.broadcast %3 : vector<1x128xf32> to vector<16x128xf32>
    %5 = arith.addf %2, %4 : vector<16x128xf32>
    %cst_5 = arith.constant 0.000000e+00 : f32
    %6 = vector.broadcast %cst_5 : f32 to vector<16x128xf32>
    %7 = arith.maximumf %5, %6 : vector<16x128xf32>
    %c0_6 = arith.constant 0 : index
    %c0_7 = arith.constant 0 : index
    %8 = vector.load %arg4[%c0_6, %c0_7] : memref<128x128xf32, #tpu.memory_space<vmem>>, vector<128x128xf32>
    %cst_8 = arith.constant dense<0.000000e+00> : vector<16x128xf32>
    %9 = tpu.matmul %7, %8, %cst_8 {dimension_numbers = #tpu.dot_dimension_numbers<[1], [0], [0], [1], [0, 0, 1, 1], [], []>} : vector<16x128xf32>, vector<128x128xf32>, vector<16x128xf32> -> vector<16x128xf32>
    %c0_9 = arith.constant 0 : index
    %c0_10 = arith.constant 0 : index
    %10 = vector.load %arg5[%c0_9, %c0_10] : memref<1x128xf32, #tpu.memory_space<vmem>>, vector<1x128xf32>
    %11 = vector.broadcast %10 : vector<1x128xf32> to vector<16x128xf32>
    %12 = arith.addf %9, %11 : vector<16x128xf32>
    %13 = arith.addf %12, %0 : vector<16x128xf32>
    %c0_11 = arith.constant 0 : index
    %c0_12 = arith.constant 0 : index
    %14 = vector.load %arg6[%c0_11, %c0_12] : memref<16x128xf32, #tpu.memory_space<vmem>>, vector<16x128xf32>
    tpu.vector_store %arg6[%c0_11, %c0_12], %13 {strides = array<i32>} : memref<16x128xf32, #tpu.memory_space<vmem>>, vector<16x128xf32>,
    return
  }
  func.func @transform_0(%arg0: i32) -> (i32, i32) {
    %c0_i32 = arith.constant 0 : i32
    %c0_i32_0 = arith.constant 0 : i32
    return %arg0, %c0_i32 : i32, i32
  }
  func.func @transform_1(%arg0: i32) -> (i32, i32) {
    %c0_i32 = arith.constant 0 : i32
    %c0_i32_0 = arith.constant 0 : i32
    %c0_i32_1 = arith.constant 0 : i32
    return %c0_i32, %c0_i32_0 : i32, i32
  }
  func.func @transform_2(%arg0: i32) -> (i32, i32) {
    %c0_i32 = arith.constant 0 : i32
    %c0_i32_0 = arith.constant 0 : i32
    %c0_i32_1 = arith.constant 0 : i32
    return %c0_i32, %c0_i32_0 : i32, i32
  }
  func.func @transform_3(%arg0: i32) -> (i32, i32) {
    %c0_i32 = arith.constant 0 : i32
    %c0_i32_0 = arith.constant 0 : i32
    %c0_i32_1 = arith.constant 0 : i32
    return %c0_i32, %c0_i32_0 : i32, i32
  }
  func.func @transform_4(%arg0: i32) -> (i32, i32) {
    %c0_i32 = arith.constant 0 : i32
    %c0_i32_0 = arith.constant 0 : i32
    %c0_i32_1 = arith.constant 0 : i32
    return %c0_i32, %c0_i32_0 : i32, i32
  }
  func.func @transform_5(%arg0: i32) -> (i32, i32) {
    %c0_i32 = arith.constant 0 : i32
    %c0_i32_0 = arith.constant 0 : i32
    return %arg0, %c0_i32 : i32, i32
  }
}

</mosaic_0001>

<bundles_post_ra>
// kernel: pointwise_ffn.1
= control target key start
LH: loop header
LB: loop body
LE: loop exit
PB: predicated region body
PF: predicated region fallthrough
CT: control target
= control target key end

     0   :  { %s296_s1 = inlined_call_operand.vmem [shape: f32[128,128], index: 1, kind: input, shape index: {}]   ;;  %s297_s3 = inlined_call_operand.vmem [shape: f32[128,128], index: 3, kind: input, shape index: {}]   ;;  %s298_s2 = inlined_call_operand.vmem [shape: f32[1,128], index: 2, kind: input, shape index: {}]   ;;  %s299_s0 = inlined_call_operand.vmem [shape: f32[16,128], index: 0, kind: input, shape index: {}]   ;;  %s300_s4 = inlined_call_operand.vmem [shape: f32[1,128], index: 4, kind: input, shape index: {}]   ;;  %s301_s5 = inlined_call_operand.vmem [shape: f32[16,128], index: 5, kind: output, shape index: {}]  }
   0x1   :  { %v37_v0 = vld [vmem:[%s296_s1 + $0x78] sm:$0xff]  ;;  %v36_v1 = vld [vmem:[%s296_s1 + $0x70] sm:$0xff]  ;;  %v35_v2 = vld [vmem:[%s296_s1 + $0x68] sm:$0xff] }
   0x2   :  { %118 = vmatpush.msra.mxu2 %v37_v0  ;;  %42 = vmatpush.msra.mxu0 %v37_v0  ;;  %v34_v3 = vld [vmem:[%s296_s1 + $0x60] sm:$0xff]  ;;  %v33_v4 = vld [vmem:[%s296_s1 + $0x58] sm:$0xff]  ;;  %v81_v6 = vld [vmem:[%s297_s3 + $0x70] sm:$0xff] }
   0x3   :  { %v82_v5 = vld [vmem:[%s297_s3 + $0x78] sm:$0xff]  ;;  %v32_v7 = vld [vmem:[%s296_s1 + $0x50] sm:$0xff]  ;;  %v80_v8 = vld [vmem:[%s297_s3 + $0x68] sm:$0xff] }
   0x4   :  { %119 = vmatpush.msra.mxu2 %v36_v1  ;;  %43 = vmatpush.msra.mxu0 %v36_v1  ;;  %v31_v9 = vld [vmem:[%s296_s1 + $0x48] sm:$0xff]  ;;  %v79_v10 = vld [vmem:[%s297_s3 + $0x60] sm:$0xff]  ;;  %v78_v12 = vld [vmem:[%s297_s3 + $0x58] sm:$0xff] }
   0x5   :  { %134 = vmatpush.msra.mxu3 %v82_v5  ;;  %87 = vmatpush.msra.mxu1 %v82_v5  ;;  %v30_v11 = vld [vmem:[%s296_s1 + $0x40] sm:$0xff]  ;;  %v29_v13 = vld [vmem:[%s296_s1 + $0x38] sm:$0xff]  ;;  %v77_v14 = vld [vmem:[%s297_s3 + $0x50] sm:$0xff] }
   0x6   :  { %120 = vmatpush.msra.mxu2 %v35_v2  ;;  %44 = vmatpush.msra.mxu0 %v35_v2  ;;  %v28_v15 = vld [vmem:[%s296_s1 + $0x30] sm:$0xff]  ;;  %v76_v16 = vld [vmem:[%s297_s3 + $0x48] sm:$0xff]  ;;  %v75_v18 = vld [vmem:[%s297_s3 + $0x40] sm:$0xff] }
   0x7   :  { %135 = vmatpush.msra.mxu3 %v81_v6  ;;  %88 = vmatpush.msra.mxu1 %v81_v6  ;;  %v27_v17 = vld [vmem:[%s296_s1 + $0x28] sm:$0xff]  ;;  %v26_v19 = vld [vmem:[%s296_s1 + $0x20] sm:$0xff]  ;;  %v74_v20 = vld [vmem:[%s297_s3 + $0x38] sm:$0xff] }
   0x8   :  { %121 = vmatpush.msra.mxu2 %v34_v3  ;;  %45 = vmatpush.msra.mxu0 %v34_v3  ;;  %v25_v21 = vld [vmem:[%s296_s1 + $0x18] sm:$0xff]  ;;  %v73_v22 = vld [vmem:[%s297_s3 + $0x30] sm:$0xff]  ;;  %v72_v24 = vld [vmem:[%s297_s3 + $0x28] sm:$0xff] }
   0x9   :  { %136 = vmatpush.msra.mxu3 %v80_v8  ;;  %89 = vmatpush.msra.mxu1 %v80_v8  ;;  %v24_v23 = vld [vmem:[%s296_s1 + $0x10] sm:$0xff]  ;;  %v23_v25 = vld [vmem:[%s296_s1 + $0x8] sm:$0xff]  ;;  %v71_v26 = vld [vmem:[%s297_s3 + $0x20] sm:$0xff] }
   0xa   :  { %122 = vmatpush.msra.mxu2 %v33_v4  ;;  %46 = vmatpush.msra.mxu0 %v33_v4  ;;  %v22_v27 = vld [vmem:[%s296_s1] sm:$0xff]  ;;  %v21_v28 = vld [vmem:[%s299_s0 + $0x8] sm:$0xff]  ;;  %v70_v30 = vld [vmem:[%s297_s3 + $0x18] sm:$0xff] }
   0xb   :  { %137 = vmatpush.msra.mxu3 %v79_v10  ;;  %90 = vmatpush.msra.mxu1 %v79_v10  ;;  %v20_v29 = vld [vmem:[%s299_s0] sm:$0xff]  ;;  %v69_v31 = vld [vmem:[%s297_s3 + $0x10] sm:$0xff]  ;;  %v68_v32 = vld [vmem:[%s297_s3 + $0x8] sm:$0xff] }
   0xc   :  { %123 = vmatpush.msra.mxu2 %v32_v7  ;;  %47 = vmatpush.msra.mxu0 %v32_v7  ;;  %v67_v33 = vld [vmem:[%s297_s3] sm:$0xff] }
   0xd   :  { %138 = vmatpush.msra.mxu3 %v78_v12  ;;  %91 = vmatpush.msra.mxu1 %v78_v12  ;;  %v150_v34 = vld [vmem:[%s298_s2] ss:$0 sm:$0xff] }
   0xe   :  { %124 = vmatpush.msra.mxu2 %v31_v9  ;;  %48 = vmatpush.msra.mxu0 %v31_v9  ;;  %v151_v41 = vld [vmem:[%s300_s4] ss:$0 sm:$0xff] }
   0xf   :  { %139 = vmatpush.msra.mxu3 %v77_v14  ;;  %92 = vmatpush.msra.mxu1 %v77_v14 }
  0x10   :  { %125 = vmatpush.msra.mxu2 %v30_v11  ;;  %49 = vmatpush.msra.mxu0 %v30_v11 }
  0x11   :  { %140 = vmatpush.msra.mxu3 %v76_v16  ;;  %93 = vmatpush.msra.mxu1 %v76_v16 }
  0x12   :  { %126 = vmatpush.msra.mxu2 %v29_v13  ;;  %50 = vmatpush.msra.mxu0 %v29_v13 }
  0x13   :  { %141 = vmatpush.msra.mxu3 %v75_v18  ;;  %94 = vmatpush.msra.mxu1 %v75_v18 }
  0x14   :  { %127 = vmatpush.msra.mxu2 %v28_v15  ;;  %51 = vmatpush.msra.mxu0 %v28_v15 }
  0x15   :  { %142 = vmatpush.msra.mxu3 %v74_v20  ;;  %95 = vmatpush.msra.mxu1 %v74_v20 }
  0x16   :  { %128 = vmatpush.msra.mxu2 %v27_v17  ;;  %52 = vmatpush.msra.mxu0 %v27_v17 }
  0x17   :  { %143 = vmatpush.msra.mxu3 %v73_v22  ;;  %96 = vmatpush.msra.mxu1 %v73_v22 }
  0x18   :  { %129 = vmatpush.msra.mxu2 %v26_v19  ;;  %53 = vmatpush.msra.mxu0 %v26_v19 }
  0x19   :  { %144 = vmatpush.msra.mxu3 %v72_v24  ;;  %97 = vmatpush.msra.mxu1 %v72_v24 }
  0x1a   :  { %130 = vmatpush.msra.mxu2 %v25_v21  ;;  %54 = vmatpush.msra.mxu0 %v25_v21 }
  0x1b   :  { %145 = vmatpush.msra.mxu3 %v71_v26  ;;  %98 = vmatpush.msra.mxu1 %v71_v26 }
  0x1c   :  { %131 = vmatpush.msra.mxu2 %v24_v23  ;;  %55 = vmatpush.msra.mxu0 %v24_v23 }
  0x1d   :  { %146 = vmatpush.msra.mxu3 %v70_v30  ;;  %99 = vmatpush.msra.mxu1 %v70_v30 }
  0x1e   :  { %132 = vmatpush.msra.mxu2 %v23_v25  ;;  %56 = vmatpush.msra.mxu0 %v23_v25 }
  0x1f   :  { %147 = vmatpush.msra.mxu3 %v69_v31  ;;  %100 = vmatpush.msra.mxu1 %v69_v31 }
  0x20   :  { %133 = vmatpush.msra.mxu2 %v22_v27  ;;  %57 = vmatpush.msra.mxu0 %v22_v27 }
  0x21   :  { %61 = vmatmul.f32.vlgmr.msra.gmra.mxu2 %v21_v28  ;;  %58 = vmatmul.f32.vlgmr.msra.gmra.mxu0 %v20_v29 }
  0x22   :  { %148 = vmatpush.msra.mxu3 %v68_v32  ;;  %101 = vmatpush.msra.mxu1 %v68_v32 }
  0x24   :  { %149 = vmatpush.msra.mxu3 %v67_v33  ;;  %102 = vmatpush.msra.mxu1 %v67_v33 }
  0x9e   :  { %v59_v35 = vpop.f32.mrf.mxu0 }
  0x9f   :  { %v60_v36 = vadd.f32 %v150_v34, %v59_v35 }
  0xa1   :  { %v65_v37 = vmax.f32 %v60_v36, 0.0 }
  0xa3   :  { %103 = vmatmul.f32.vlgmr.msra.gmra.mxu1 %v65_v37 }
  0xa4   :  { %v62_v38 = vpop.f32.mrf.mxu2 }
  0xa5   :  { %v63_v39 = vadd.f32 %v150_v34, %v62_v38 }
  0xa7   :  { %v66_v40 = vmax.f32 %v63_v39, 0.0 }
  0xa9   :  { %106 = vmatmul.f32.vlgmr.msra.gmra.mxu3 %v66_v40 }
 0x120   :  { %v104_v42 = vpop.f32.mrf.mxu1 }
 0x121   :  { %v105_v43 = vadd.f32 %v151_v41, %v104_v42 }
 0x123   :  { %v110_v44 = vadd.f32 %v105_v43, %v20_v29 }
 0x125   :  { %112 = vst [vmem:[%s301_s5] sm:$0xff] %v110_v44 }
 0x12c   :  { %v107_v45 = vpop.f32.mrf.mxu3 }
 0x12d   :  { %v108_v46 = vadd.f32 %v151_v41, %v107_v45 }
 0x12f   :  { %v111_v47 = vadd.f32 %v108_v46, %v21_v28 }
 0x131   :  { %113 = vst [vmem:[%s301_s5 + $0x8] sm:$0xff] %v111_v47 }

</bundles_post_ra>
